<compile_context>
chip_gen: v7x
topology: tpu7x:2x2x1
jax: 0.10.0
libtpu: 0.0.40
codegen_flags: <defaults>
</compile_context>

<pallas_src>
import jax
import jax.numpy as jnp
from jax.experimental import pallas as pl
from jax.experimental.pallas import tpu as pltpu

# Module-consistent small shapes: stride=1, kernel_size=3, in_planes != out_planes -> shortcut active.
N, L = 2, 16          # batch, sequence length
CIN, COUT = 4, 8      # in_planes, out_planes
K = 3                 # kernel_size
P = K // 2            # "same" padding
EPS = 1e-5
CP = 128              # lane-dense padded OUTPUT-channel width (full 128 lanes)
CK = 8                # contraction-dim padding (f32 sublane granule)
NL = N * L

assert CIN <= CK and COUT <= CK, "contraction padding must cover the real channel counts"

# rows of the packed per-channel parameter buffer (BN gammas / betas only; conv biases are
# mathematically cancelled by train-mode BN and therefore dropped from the kernel)
_G1, _BE1, _G2, _BE2, _GS, _BES = range(6)
PP_ROWS = 8           # padded to a full sublane multiple


# ---------------- Pallas kernel ----------------

def basic_block_kernel(x_ref, w1_ref, w2_ref, ws_ref, pp_ref, out_ref):
    # x_ref: (NL, CK); w1_ref/w2_ref: (K, CK, CP); ws_ref: (CK, CP); pp_ref: (PP_ROWS, CP)
    # out_ref: (NL, CP) -- lane-dense output.
    x2d = x_ref[...]                                   # (NL, CK) f32

    g1  = pp_ref[_G1:_G1 + 1, :]
    be1 = pp_ref[_BE1:_BE1 + 1, :]
    g2  = pp_ref[_G2:_G2 + 1, :]
    be2 = pp_ref[_BE2:_BE2 + 1, :]
    gs  = pp_ref[_GS:_GS + 1, :]
    bes = pp_ref[_BES:_BES + 1, :]

    inv_nl = jnp.float32(1.0 / NL)

    # hoisted halo masks: row r = n*L + l; tap offset d = k - P reads l + d, which is invalid
    # (zero-padded in "same" conv) when l + d falls outside [0, L).
    l_idx = jax.lax.broadcasted_iota(jnp.int32, (NL, CK), 0) % L
    halo_mask = {}
    for k in range(K):
        d = k - P
        if d == 0:
            continue
        halo_mask[k] = (l_idx < -d) if d < 0 else (l_idx >= L - d)

    def conv_same(h8, w_ref):
        # "same"-padded stride-1 conv as K 2D MXU matmuls on sublane-rolled operands.
        # Rolls (XLU) + masks (VPU) stay off the MXU/DMA critical path; no VMEM relayouts.
        # NOTE: at realistic sizes, cast the matmul operands to bf16 here (keep
        # preferred_element_type=f32 accumulation) for full-rate MXU on v5e/v6e/v7x.
        acc = jnp.dot(h8, w_ref[P], preferred_element_type=jnp.float32)   # center tap
        for k in range(K):                                                # static unrolled taps
            d = k - P
            if d == 0:
                continue
            rolled = pltpu.roll(h8, shift=(-d) % NL, axis=0)              # row r holds h[l + d]
            shifted = jnp.where(halo_mask[k], 0.0, rolled)                # zero the halo rows
            acc = acc + jnp.dot(shifted, w_ref[k], preferred_element_type=jnp.float32)
        return acc

    def bn_train(h, gamma, beta):
        # single-pass stats (sum, sum-of-squares) folded into one per-channel scale+shift FMA.
        # (E[x^2]-E[x]^2 is fine at NL=32; switch to two-pass/Welford at real sizes.)
        s  = jnp.sum(h, axis=0, keepdims=True)          # (1, CP)
        sq = jnp.sum(h * h, axis=0, keepdims=True)      # (1, CP)
        mean = s * inv_nl
        var = sq * inv_nl - mean * mean                 # biased variance (PyTorch normalization)
        scale = gamma * jax.lax.rsqrt(var + EPS)
        shift = beta - mean * scale
        return h * scale + shift

    # out = relu(bn1(conv1(x)))        (conv bias omitted: cancelled by BN mean subtraction)
    h = conv_same(x2d, w1_ref)
    h = jnp.maximum(bn_train(h, g1, be1), 0.0)

    # out = bn2(conv2(out))
    # padded lanes of h are exactly 0 (padded gammas/betas are 0), so the first CK lanes hold the
    # real channels -> static lane slice keeps conv2's contraction at CK=8.
    h = conv_same(h[:, :CK], w2_ref)
    h = bn_train(h, g2, be2)

    # shortcut: 1x1 conv (single 2D matmul) + BN   (active because in_planes != out_planes)
    s = jnp.dot(x2d, ws_ref[...], preferred_element_type=jnp.float32)
    s = bn_train(s, gs, bes)

    # out = relu(out + shortcut)  -> lane-dense, unmasked store
    out_ref[...] = jnp.maximum(h + s, 0.0)


# ---------------- one-time parameter padding / packing (hoisted out of the hot path) ----------------

def prepare_params(params):
    (w1, b1, g1, be1, w2, b2, g2, be2, ws, bs, gs, bes) = params
    del b1, b2, bs  # conv biases are exactly cancelled by the following train-mode BN

    # only the OUTPUT-channel dim is padded to 128 lanes; the contraction dim pads to CK=8.
    w1p = jnp.pad(w1, ((0, 0), (0, CK - CIN), (0, CP - COUT)))    # (K, CK, CP)
    w2p = jnp.pad(w2, ((0, 0), (0, CK - COUT), (0, CP - COUT)))   # (K, CK, CP)
    wsp = jnp.pad(ws, ((0, CK - CIN), (0, CP - COUT)))            # (CK, CP)

    def row(v):  # (1, COUT) -> (CP,)
        return jnp.pad(v.reshape(-1), (0, CP - COUT))

    pp = jnp.stack([row(g1), row(be1), row(g2), row(be2), row(gs), row(bes)]
                   + [jnp.zeros((CP,), jnp.float32)] * (PP_ROWS - 6))   # (PP_ROWS, CP)
    return (w1p, w2p, wsp, pp)


# ---------------- per-call wrapper (jitted; pad/reshape/slice fuse into one XLA program) ----------------

@jax.jit
def basic_block(x, padded_params):
    w1p, w2p, wsp, pp = padded_params
    xp = jnp.pad(x, ((0, 0), (0, 0), (0, CK - CIN))).reshape(NL, CK)   # (NL, CK) view for the kernel

    ins = (xp, w1p, w2p, wsp, pp)

    def full_spec(a):
        return pl.BlockSpec(a.shape, lambda i, _r=a.ndim: (0,) * _r)

    # grid=(1,) keeps the whole batch resident so training-mode BN stats over (N, L) stay exact.
    out2d = pl.pallas_call(
        basic_block_kernel,
        out_shape=jax.ShapeDtypeStruct((NL, CP), jnp.float32),
        grid=(1,),
        in_specs=[full_spec(a) for a in ins],
        out_specs=pl.BlockSpec((NL, CP), lambda i: (0, 0)),
        compiler_params=pltpu.CompilerParams(dimension_semantics=("arbitrary",)),
    )(*ins)

    # TODO(synk): keep the lane-padded (..., 128) layout if the consumer accepts it; this slice
    # exists only to match the module's (N, L, COUT) output shape.
    return out2d.reshape(N, L, CP)[..., :COUT]


# ---------------- deterministic parameter init (synthetic, matches module shapes) ----------------

def init_params(key):
    ks = jax.random.split(key, 6)
    w1 = jax.random.normal(ks[0], (K, CIN, COUT), jnp.float32) * 0.2   # conv1.weight (transposed layout)
    b1 = jax.random.normal(ks[1], (1, COUT), jnp.float32) * 0.05       # conv1.bias
    w2 = jax.random.normal(ks[2], (K, COUT, COUT), jnp.float32) * 0.2  # conv2.weight
    b2 = jax.random.normal(ks[3], (1, COUT), jnp.float32) * 0.05       # conv2.bias
    ws = jax.random.normal(ks[4], (CIN, COUT), jnp.float32) * 0.2      # shortcut 1x1 conv weight
    bs = jax.random.normal(ks[5], (1, COUT), jnp.float32) * 0.05       # shortcut conv bias
    ones = jnp.ones((1, COUT), jnp.float32)                            # BN gammas (PyTorch init)
    zeros = jnp.zeros((1, COUT), jnp.float32)                          # BN betas
    return (w1, b1, ones, zeros, w2, b2, ones, zeros, ws, bs, ones, zeros)


# ---------------- pure-JAX reference for correctness check (WITH conv biases) ----------------

def reference(x, params):
    (w1, b1, g1, be1, w2, b2, g2, be2, ws, bs, gs, bes) = params

    def conv(h, w, b):
        y = jax.lax.conv_general_dilated(h, w, window_strides=(1,), padding=[(P, P)],
                                         dimension_numbers=("NWC", "WIO", "NWC"))
        return y + b[None]

    def bn(h, g, be):
        m = h.mean(axis=(0, 1), keepdims=True)
        v = ((h - m) ** 2).mean(axis=(0, 1), keepdims=True)
        return g[None] * (h - m) / jnp.sqrt(v + EPS) + be[None]

    h = jax.nn.relu(bn(conv(x, w1, b1), g1, be1))
    h = bn(conv(h, w2, b2), g2, be2)
    s = bn(jnp.einsum("nlc,co->nlo", x, ws) + bs[None], gs, bes)
    return jax.nn.relu(h + s)


if __name__ == "__main__":
    key = jax.random.PRNGKey(0)
    kx, kp = jax.random.split(key)
    x = jax.random.normal(kx, (N, L, CIN), jnp.float32)
    params = init_params(kp)

    padded_params = prepare_params(params)                       # one-time padding/packing
    padded_params = jax.tree_util.tree_map(jax.block_until_ready, padded_params)

    out = basic_block(x, padded_params)
    out = jax.block_until_ready(out)

    ref = reference(x, params)
    assert out.shape == (N, L, COUT)
    max_err = float(jnp.max(jnp.abs(out - ref)))
    if not bool(jnp.allclose(out, ref, atol=3e-2, rtol=3e-2)):
        raise AssertionError(f"mismatch vs JAX reference: max abs err {max_err}")
    print("KERNEL_OK")
</pallas_src>

<mosaic_0001>
module attributes {stable_mosaic.version = 11 : i64} {
  func.func @basic_block_kernel(%arg0: i32, %arg1: memref<32x8xf32, #tpu.memory_space<vmem>>, %arg2: memref<3x8x128xf32, #tpu.memory_space<vmem>>, %arg3: memref<3x8x128xf32, #tpu.memory_space<vmem>>, %arg4: memref<8x128xf32, #tpu.memory_space<vmem>>, %arg5: memref<8x128xf32, #tpu.memory_space<vmem>>, %arg6: memref<32x128xf32, #tpu.memory_space<vmem>>) attributes {dimension_semantics = [#tpu.dimension_semantics<arbitrary>], iteration_bounds = array<i64: 1>, scalar_prefetch = 0 : i64, scratch_operands = 0 : i64, tpu.core_type = #tpu.core_type<tc>, window_params = [{pipeline_mode = #tpu.pipeline_mode<synchronous>, transform_indices = @transform_0, window_bounds = array<i64: 32, 8>}, {pipeline_mode = #tpu.pipeline_mode<synchronous>, transform_indices = @transform_1, window_bounds = array<i64: 3, 8, 128>}, {pipeline_mode = #tpu.pipeline_mode<synchronous>, transform_indices = @transform_2, window_bounds = array<i64: 3, 8, 128>}, {pipeline_mode = #tpu.pipeline_mode<synchronous>, transform_indices = @transform_3, window_bounds = array<i64: 8, 128>}, {pipeline_mode = #tpu.pipeline_mode<synchronous>, transform_indices = @transform_4, window_bounds = array<i64: 8, 128>}, {pipeline_mode = #tpu.pipeline_mode<synchronous>, transform_indices = @transform_5, window_bounds = array<i64: 32, 128>}]} {
    %c0 = arith.constant 0 : index
    %c0_0 = arith.constant 0 : index
    %0 = vector.load %arg1[%c0, %c0_0] : memref<32x8xf32, #tpu.memory_space<vmem>>, vector<32x8xf32>
    %c0_1 = arith.constant 0 : index
    %c0_2 = arith.constant 0 : index
    %1 = vector.load %arg5[%c0_1, %c0_2] : memref<8x128xf32, #tpu.memory_space<vmem>>, vector<1x128xf32>
    %c1 = arith.constant 1 : index
    %c0_3 = arith.constant 0 : index
    %2 = vector.load %arg5[%c1, %c0_3] : memref<8x128xf32, #tpu.memory_space<vmem>>, vector<1x128xf32>
    %c2 = arith.constant 2 : index
    %c0_4 = arith.constant 0 : index
    %3 = vector.load %arg5[%c2, %c0_4] : memref<8x128xf32, #tpu.memory_space<vmem>>, vector<1x128xf32>
    %c3 = arith.constant 3 : index
    %c0_5 = arith.constant 0 : index
    %4 = vector.load %arg5[%c3, %c0_5] : memref<8x128xf32, #tpu.memory_space<vmem>>, vector<1x128xf32>
    %c4 = arith.constant 4 : index
    %c0_6 = arith.constant 0 : index
    %5 = vector.load %arg5[%c4, %c0_6] : memref<8x128xf32, #tpu.memory_space<vmem>>, vector<1x128xf32>
    %c5 = arith.constant 5 : index
    %c0_7 = arith.constant 0 : index
    %6 = vector.load %arg5[%c5, %c0_7] : memref<8x128xf32, #tpu.memory_space<vmem>>, vector<1x128xf32>
    %7 = tpu.iota {dimensions = array<i32: 0>} : vector<32x8xi32>
    %c16_i32 = arith.constant 16 : i32
    %c0_i32 = arith.constant 0 : i32
    %8 = arith.cmpi eq, %c16_i32, %c0_i32 : i32
    %c1_i32 = arith.constant 1 : i32
    %9 = arith.select %8, %c1_i32, %c16_i32 : i32
    %10 = vector.broadcast %9 : i32 to vector<32x8xi32>
    %11 = arith.remsi %7, %10 : vector<32x8xi32>
    %c0_i32_8 = arith.constant 0 : i32
    %12 = vector.broadcast %c0_i32_8 : i32 to vector<32x8xi32>
    %13 = arith.cmpi ne, %11, %12 : vector<32x8xi32>
    %c0_i32_9 = arith.constant 0 : i32
    %14 = vector.broadcast %c0_i32_9 : i32 to vector<32x8xi32>
    %15 = arith.cmpi slt, %11, %14 : vector<32x8xi32>
    %c0_i32_10 = arith.constant 0 : i32
    %16 = arith.cmpi slt, %9, %c0_i32_10 : i32
    %17 = vector.broadcast %16 : i1 to vector<32x8xi1>
    %18 = vector.broadcast %17 : vector<32x8xi1> to vector<32x8xi1>
    %19 = arith.xori %15, %18 : vector<32x8xi1>
    %20 = arith.andi %19, %13 : vector<32x8xi1>
    %21 = vector.broadcast %9 : i32 to vector<32x8xi32>
    %22 = arith.addi %11, %21 : vector<32x8xi32>
    %23 = arith.select %20, %22, %11 : vector<32x8xi1>, vector<32x8xi32>
    %c1_i32_11 = arith.constant 1 : i32
    %24 = vector.broadcast %c1_i32_11 : i32 to vector<32x8xi32>
    %25 = arith.cmpi slt, %23, %24 : vector<32x8xi32>
    %c15_i32 = arith.constant 15 : i32
    %26 = vector.broadcast %c15_i32 : i32 to vector<32x8xi32>
    %27 = arith.cmpi sge, %23, %26 : vector<32x8xi32>
    %c1_12 = arith.constant 1 : index
    %c0_13 = arith.constant 0 : index
    %c0_14 = arith.constant 0 : index
    %28 = vector.load %arg2[%c1_12, %c0_13, %c0_14] : memref<3x8x128xf32, #tpu.memory_space<vmem>>, vector<1x8x128xf32>
    %29 = vector.shape_cast %28 : vector<1x8x128xf32> to vector<8x128xf32>
    %cst = arith.constant dense<0.000000e+00> : vector<32x128xf32>
    %30 = tpu.matmul %0, %29, %cst {dimension_numbers = #tpu.dot_dimension_numbers<[1], [0], [0], [1], [0, 0, 1, 1], [], []>} : vector<32x8xf32>, vector<8x128xf32>, vector<32x128xf32> -> vector<32x128xf32>
    %c1_i32_15 = arith.constant 1 : i32
    %31 = tpu.dynamic_rotate %0 by %c1_i32_15 dim 0 : vector<32x8xf32>, i32 -> vector<32x8xf32>
    %cst_16 = arith.constant 0.000000e+00 : f32
    %32 = vector.broadcast %cst_16 : f32 to vector<32x8xf32>
    %33 = arith.select %25, %32, %31 : vector<32x8xi1>, vector<32x8xf32>
    %c0_17 = arith.constant 0 : index
    %c0_18 = arith.constant 0 : index
    %c0_19 = arith.constant 0 : index
    %34 = vector.load %arg2[%c0_17, %c0_18, %c0_19] : memref<3x8x128xf32, #tpu.memory_space<vmem>>, vector<1x8x128xf32>
    %35 = vector.shape_cast %34 : vector<1x8x128xf32> to vector<8x128xf32>
    %cst_20 = arith.constant dense<0.000000e+00> : vector<32x128xf32>
    %36 = tpu.matmul %33, %35, %cst_20 {dimension_numbers = #tpu.dot_dimension_numbers<[1], [0], [0], [1], [0, 0, 1, 1], [], []>} : vector<32x8xf32>, vector<8x128xf32>, vector<32x128xf32> -> vector<32x128xf32>
    %37 = arith.addf %30, %36 : vector<32x128xf32>
    %c31_i32 = arith.constant 31 : i32
    %38 = tpu.dynamic_rotate %0 by %c31_i32 dim 0 : vector<32x8xf32>, i32 -> vector<32x8xf32>
    %cst_21 = arith.constant 0.000000e+00 : f32
    %39 = vector.broadcast %cst_21 : f32 to vector<32x8xf32>
    %40 = arith.select %27, %39, %38 : vector<32x8xi1>, vector<32x8xf32>
    %c2_22 = arith.constant 2 : index
    %c0_23 = arith.constant 0 : index
    %c0_24 = arith.constant 0 : index
    %41 = vector.load %arg2[%c2_22, %c0_23, %c0_24] : memref<3x8x128xf32, #tpu.memory_space<vmem>>, vector<1x8x128xf32>
    %42 = vector.shape_cast %41 : vector<1x8x128xf32> to vector<8x128xf32>
    %cst_25 = arith.constant dense<0.000000e+00> : vector<32x128xf32>
    %43 = tpu.matmul %40, %42, %cst_25 {dimension_numbers = #tpu.dot_dimension_numbers<[1], [0], [0], [1], [0, 0, 1, 1], [], []>} : vector<32x8xf32>, vector<8x128xf32>, vector<32x128xf32> -> vector<32x128xf32>
    %44 = arith.addf %37, %43 : vector<32x128xf32>
    %cst_26 = arith.constant dense<0.000000e+00> : vector<128xf32>
    %45 = vector.multi_reduction <add>, %44, %cst_26 [0] : vector<32x128xf32> to vector<128xf32>
    %46 = vector.shape_cast %45 : vector<128xf32> to vector<1x128xf32>
    %47 = arith.mulf %44, %44 : vector<32x128xf32>
    %cst_27 = arith.constant dense<0.000000e+00> : vector<128xf32>
    %48 = vector.multi_reduction <add>, %47, %cst_27 [0] : vector<32x128xf32> to vector<128xf32>
    %49 = vector.shape_cast %48 : vector<128xf32> to vector<1x128xf32>
    %cst_28 = arith.constant 3.125000e-02 : f32
    %50 = vector.broadcast %cst_28 : f32 to vector<1x128xf32>
    %51 = arith.mulf %46, %50 : vector<1x128xf32>
    %cst_29 = arith.constant 3.125000e-02 : f32
    %52 = vector.broadcast %cst_29 : f32 to vector<1x128xf32>
    %53 = arith.mulf %49, %52 : vector<1x128xf32>
    %54 = arith.mulf %51, %51 : vector<1x128xf32>
    %55 = arith.subf %53, %54 : vector<1x128xf32>
    %cst_30 = arith.constant 9.99999974E-6 : f32
    %56 = vector.broadcast %cst_30 : f32 to vector<1x128xf32>
    %57 = arith.addf %55, %56 : vector<1x128xf32>
    %58 = math.rsqrt %57 : vector<1x128xf32>
    %59 = arith.mulf %1, %58 : vector<1x128xf32>
    %60 = arith.mulf %51, %59 : vector<1x128xf32>
    %61 = arith.subf %2, %60 : vector<1x128xf32>
    %62 = vector.broadcast %59 : vector<1x128xf32> to vector<32x128xf32>
    %63 = arith.mulf %44, %62 : vector<32x128xf32>
    %64 = vector.broadcast %61 : vector<1x128xf32> to vector<32x128xf32>
    %65 = arith.addf %63, %64 : vector<32x128xf32>
    %cst_31 = arith.constant 0.000000e+00 : f32
    %66 = vector.broadcast %cst_31 : f32 to vector<32x128xf32>
    %67 = arith.maximumf %65, %66 : vector<32x128xf32>
    %68 = vector.extract_strided_slice %67 {offsets = [0, 0], sizes = [32, 8], strides = [1, 1]} : vector<32x128xf32> to vector<32x8xf32>
    %c1_32 = arith.constant 1 : index
    %c0_33 = arith.constant 0 : index
    %c0_34 = arith.constant 0 : index
    %69 = vector.load %arg3[%c1_32, %c0_33, %c0_34] : memref<3x8x128xf32, #tpu.memory_space<vmem>>, vector<1x8x128xf32>
    %70 = vector.shape_cast %69 : vector<1x8x128xf32> to vector<8x128xf32>
    %cst_35 = arith.constant dense<0.000000e+00> : vector<32x128xf32>
    %71 = tpu.matmul %68, %70, %cst_35 {dimension_numbers = #tpu.dot_dimension_numbers<[1], [0], [0], [1], [0, 0, 1, 1], [], []>} : vector<32x8xf32>, vector<8x128xf32>, vector<32x128xf32> -> vector<32x128xf32>
    %c1_i32_36 = arith.constant 1 : i32
    %72 = tpu.dynamic_rotate %68 by %c1_i32_36 dim 0 : vector<32x8xf32>, i32 -> vector<32x8xf32>
    %cst_37 = arith.constant 0.000000e+00 : f32
    %73 = vector.broadcast %cst_37 : f32 to vector<32x8xf32>
    %74 = arith.select %25, %73, %72 : vector<32x8xi1>, vector<32x8xf32>
    %c0_38 = arith.constant 0 : index
    %c0_39 = arith.constant 0 : index
    %c0_40 = arith.constant 0 : index
    %75 = vector.load %arg3[%c0_38, %c0_39, %c0_40] : memref<3x8x128xf32, #tpu.memory_space<vmem>>, vector<1x8x128xf32>
    %76 = vector.shape_cast %75 : vector<1x8x128xf32> to vector<8x128xf32>
    %cst_41 = arith.constant dense<0.000000e+00> : vector<32x128xf32>
    %77 = tpu.matmul %74, %76, %cst_41 {dimension_numbers = #tpu.dot_dimension_numbers<[1], [0], [0], [1], [0, 0, 1, 1], [], []>} : vector<32x8xf32>, vector<8x128xf32>, vector<32x128xf32> -> vector<32x128xf32>
    %78 = arith.addf %71, %77 : vector<32x128xf32>
    %c31_i32_42 = arith.constant 31 : i32
    %79 = tpu.dynamic_rotate %68 by %c31_i32_42 dim 0 : vector<32x8xf32>, i32 -> vector<32x8xf32>
    %cst_43 = arith.constant 0.000000e+00 : f32
    %80 = vector.broadcast %cst_43 : f32 to vector<32x8xf32>
    %81 = arith.select %27, %80, %79 : vector<32x8xi1>, vector<32x8xf32>
    %c2_44 = arith.constant 2 : index
    %c0_45 = arith.constant 0 : index
    %c0_46 = arith.constant 0 : index
    %82 = vector.load %arg3[%c2_44, %c0_45, %c0_46] : memref<3x8x128xf32, #tpu.memory_space<vmem>>, vector<1x8x128xf32>
    %83 = vector.shape_cast %82 : vector<1x8x128xf32> to vector<8x128xf32>
    %cst_47 = arith.constant dense<0.000000e+00> : vector<32x128xf32>
    %84 = tpu.matmul %81, %83, %cst_47 {dimension_numbers = #tpu.dot_dimension_numbers<[1], [0], [0], [1], [0, 0, 1, 1], [], []>} : vector<32x8xf32>, vector<8x128xf32>, vector<32x128xf32> -> vector<32x128xf32>
    %85 = arith.addf %78, %84 : vector<32x128xf32>
    %cst_48 = arith.constant dense<0.000000e+00> : vector<128xf32>
    %86 = vector.multi_reduction <add>, %85, %cst_48 [0] : vector<32x128xf32> to vector<128xf32>
    %87 = vector.shape_cast %86 : vector<128xf32> to vector<1x128xf32>
    %88 = arith.mulf %85, %85 : vector<32x128xf32>
    %cst_49 = arith.constant dense<0.000000e+00> : vector<128xf32>
    %89 = vector.multi_reduction <add>, %88, %cst_49 [0] : vector<32x128xf32> to vector<128xf32>
    %90 = vector.shape_cast %89 : vector<128xf32> to vector<1x128xf32>
    %cst_50 = arith.constant 3.125000e-02 : f32
    %91 = vector.broadcast %cst_50 : f32 to vector<1x128xf32>
    %92 = arith.mulf %87, %91 : vector<1x128xf32>
    %cst_51 = arith.constant 3.125000e-02 : f32
    %93 = vector.broadcast %cst_51 : f32 to vector<1x128xf32>
    %94 = arith.mulf %90, %93 : vector<1x128xf32>
    %95 = arith.mulf %92, %92 : vector<1x128xf32>
    %96 = arith.subf %94, %95 : vector<1x128xf32>
    %cst_52 = arith.constant 9.99999974E-6 : f32
    %97 = vector.broadcast %cst_52 : f32 to vector<1x128xf32>
    %98 = arith.addf %96, %97 : vector<1x128xf32>
    %99 = math.rsqrt %98 : vector<1x128xf32>
    %100 = arith.mulf %3, %99 : vector<1x128xf32>
    %101 = arith.mulf %92, %100 : vector<1x128xf32>
    %102 = arith.subf %4, %101 : vector<1x128xf32>
    %103 = vector.broadcast %100 : vector<1x128xf32> to vector<32x128xf32>
    %104 = arith.mulf %85, %103 : vector<32x128xf32>
    %105 = vector.broadcast %102 : vector<1x128xf32> to vector<32x128xf32>
    %106 = arith.addf %104, %105 : vector<32x128xf32>
    %c0_53 = arith.constant 0 : index
    %c0_54 = arith.constant 0 : index
    %107 = vector.load %arg4[%c0_53, %c0_54] : memref<8x128xf32, #tpu.memory_space<vmem>>, vector<8x128xf32>
    %cst_55 = arith.constant dense<0.000000e+00> : vector<32x128xf32>
    %108 = tpu.matmul %0, %107, %cst_55 {dimension_numbers = #tpu.dot_dimension_numbers<[1], [0], [0], [1], [0, 0, 1, 1], [], []>} : vector<32x8xf32>, vector<8x128xf32>, vector<32x128xf32> -> vector<32x128xf32>
    %cst_56 = arith.constant dense<0.000000e+00> : vector<128xf32>
    %109 = vector.multi_reduction <add>, %108, %cst_56 [0] : vector<32x128xf32> to vector<128xf32>
    %110 = vector.shape_cast %109 : vector<128xf32> to vector<1x128xf32>
    %111 = arith.mulf %108, %108 : vector<32x128xf32>
    %cst_57 = arith.constant dense<0.000000e+00> : vector<128xf32>
    %112 = vector.multi_reduction <add>, %111, %cst_57 [0] : vector<32x128xf32> to vector<128xf32>
    %113 = vector.shape_cast %112 : vector<128xf32> to vector<1x128xf32>
    %cst_58 = arith.constant 3.125000e-02 : f32
    %114 = vector.broadcast %cst_58 : f32 to vector<1x128xf32>
    %115 = arith.mulf %110, %114 : vector<1x128xf32>
    %cst_59 = arith.constant 3.125000e-02 : f32
    %116 = vector.broadcast %cst_59 : f32 to vector<1x128xf32>
    %117 = arith.mulf %113, %116 : vector<1x128xf32>
    %118 = arith.mulf %115, %115 : vector<1x128xf32>
    %119 = arith.subf %117, %118 : vector<1x128xf32>
    %cst_60 = arith.constant 9.99999974E-6 : f32
    %120 = vector.broadcast %cst_60 : f32 to vector<1x128xf32>
    %121 = arith.addf %119, %120 : vector<1x128xf32>
    %122 = math.rsqrt %121 : vector<1x128xf32>
    %123 = arith.mulf %5, %122 : vector<1x128xf32>
    %124 = arith.mulf %115, %123 : vector<1x128xf32>
    %125 = arith.subf %6, %124 : vector<1x128xf32>
    %126 = vector.broadcast %123 : vector<1x128xf32> to vector<32x128xf32>
    %127 = arith.mulf %108, %126 : vector<32x128xf32>
    %128 = vector.broadcast %125 : vector<1x128xf32> to vector<32x128xf32>
    %129 = arith.addf %127, %128 : vector<32x128xf32>
    %130 = arith.addf %106, %129 : vector<32x128xf32>
    %cst_61 = arith.constant 0.000000e+00 : f32
    %131 = vector.broadcast %cst_61 : f32 to vector<32x128xf32>
    %132 = arith.maximumf %130, %131 : vector<32x128xf32>
    %c0_62 = arith.constant 0 : index
    %c0_63 = arith.constant 0 : index
    %133 = vector.load %arg6[%c0_62, %c0_63] : memref<32x128xf32, #tpu.memory_space<vmem>>, vector<32x128xf32>
    tpu.vector_store %arg6[%c0_62, %c0_63], %132 {strides = array<i32>} : memref<32x128xf32, #tpu.memory_space<vmem>>, vector<32x128xf32>,
    return
  }
  func.func @transform_0(%arg0: i32) -> (i32, i32) {
    %c0_i32 = arith.constant 0 : i32
    %c0_i32_0 = arith.constant 0 : i32
    %c0_i32_1 = arith.constant 0 : i32
    return %c0_i32, %c0_i32_0 : i32, i32
  }
  func.func @transform_1(%arg0: i32) -> (i32, i32, i32) {
    %c0_i32 = arith.constant 0 : i32
    %c0_i32_0 = arith.constant 0 : i32
    %c0_i32_1 = arith.constant 0 : i32
    %c0_i32_2 = arith.constant 0 : i32
    return %c0_i32, %c0_i32_0, %c0_i32_1 : i32, i32, i32
  }
  func.func @transform_2(%arg0: i32) -> (i32, i32, i32) {
    %c0_i32 = arith.constant 0 : i32
    %c0_i32_0 = arith.constant 0 : i32
    %c0_i32_1 = arith.constant 0 : i32
    %c0_i32_2 = arith.constant 0 : i32
    return %c0_i32, %c0_i32_0, %c0_i32_1 : i32, i32, i32
  }
  func.func @transform_3(%arg0: i32) -> (i32, i32) {
    %c0_i32 = arith.constant 0 : i32
    %c0_i32_0 = arith.constant 0 : i32
    %c0_i32_1 = arith.constant 0 : i32
    return %c0_i32, %c0_i32_0 : i32, i32
  }
  func.func @transform_4(%arg0: i32) -> (i32, i32) {
    %c0_i32 = arith.constant 0 : i32
    %c0_i32_0 = arith.constant 0 : i32
    %c0_i32_1 = arith.constant 0 : i32
    return %c0_i32, %c0_i32_0 : i32, i32
  }
  func.func @transform_5(%arg0: i32) -> (i32, i32) {
    %c0_i32 = arith.constant 0 : i32
    %c0_i32_0 = arith.constant 0 : i32
    %c0_i32_1 = arith.constant 0 : i32
    return %c0_i32, %c0_i32_0 : i32, i32
  }
}

</mosaic_0001>

<bundles_post_ra>
// kernel: basic_block.1
= control target key start
LH: loop header
LB: loop body
LE: loop exit
PB: predicated region body
PF: predicated region fallthrough
CT: control target
= control target key end

     0   :  { %v30_v0 = vlaneseq  ;;  %vm107_vm1 = vcmask 64512   ;;  %s1348_s1 = inlined_call_operand.vmem [shape: f32[3,8,128], index: 1, kind: input, shape index: {}]   ;;  %s1349_s0 = inlined_call_operand.vmem [shape: f32[32,8], index: 0, kind: input, shape index: {}]   ;;  %s1350_s3 = inlined_call_operand.vmem [shape: f32[8,128], index: 3, kind: input, shape index: {}]   ;;  %s1351_s2 = inlined_call_operand.vmem [shape: f32[3,8,128], index: 2, kind: input, shape index: {}]   ;;  %s1352_s4 = inlined_call_operand.vmem [shape: f32[8,128], index: 4, kind: input, shape index: {}]   ;;  %s1353_s5 = inlined_call_operand.vmem [shape: f32[32,128], index: 5, kind: output, shape index: {}]  }
   0x1   :  { %v106_v1 = vld [vmem:[%s1348_s1] sm:$0xff]  ;;  %v1175_v3 = vld [vmem:[%s1349_s0 + $0x18] sm:$0xff]  ;;  %v989_v7 = vld [vmem:[%s1348_s1 + $0x8] sm:$0xff] }
   0x2   :  { %v20_v2 = vld [vmem:[%s1349_s0] sm:$0xff]  ;;  %1056 = vmatprep.subr.mxu0 %v106_v1  ;;  %v1177_v4 = vshrl.u32 %v30_v0, 7  ;;  %v96_v6 = vrot.slane %v1175_v3, 7  ;;  %v21_v8 = vld [vmem:[%s1349_s0 + $0x8] sm:$0xff]  ;;  %1112 = vmatprep.subr.mxu1 %v106_v1  ;;  %v22_v12 = vld [vmem:[%s1349_s0 + $0x10] sm:$0xff]  ;;  %v305_v30 = vrot.slane %v1175_v3, 1 }
   0x3   :  { %v93_v5 = vrot.slane %v20_v2, 7  ;;  %1057 = vmatpush3.msra.mxu0 %v106_v1  ;;  %v94_v9 = vrot.slane %v21_v8, 7  ;;  %1113 = vmatpush3.msra.mxu1 %v106_v1  ;;  %v95_v16 = vrot.slane %v22_v12, 7  ;;  %v998_v18 = vld [vmem:[%s1348_s1 + $0x10] sm:$0xff]  ;;  %v302_v25 = vrot.slane %v20_v2, 1  ;;  %v840_v40 = vld [vmem:[%s1350_s3] sm:$0xff] }
   0x4   :  { %v39_v10 = vand.u32 15, %v1177_v4  ;;  %vm97_vm0 = vcmp.lt.s32.totalorder %v1177_v4, 1  ;;  %1064 = vmatprep.subr.mxu0 %v989_v7  ;;  %v33_v15 = vadd.s32 16, %v1177_v4  ;;  %v32_v23 = vadd.s32 8, %v1177_v4  ;;  %v483_v41 = vld [vmem:[%s1351_s2] sm:$0xff]  ;;  %v1266_v42 = vld [vmem:[%s1351_s2 + $0x8] sm:$0xff] }
   0x5   :  { %v101_v11 = vsel %vm97_vm0, %v96_v6, %v93_v5  ;;  %v100_v14 = vsel %vm97_vm0, %v93_v5, %v94_v9  ;;  %v99_v20 = vsel %vm97_vm0, %v94_v9, %v95_v16  ;;  %v98_v22 = vsel %vm97_vm0, %v95_v16, %v96_v6  ;;  %1080 = vmatprep.subr.mxu1 %v483_v41  ;;  %v24_v16 = vld [vmem:[%s1352_s4] sm:$0x1] }
   0x6   :  { %vm1193_vm2 = vcmp.lt.s32.totalorder %v39_v10, 1  ;;  %v53_v19 = vand.u32 15, %v33_v15  ;;  %v304_v26 = vrot.slane %v22_v12, 1  ;;  %v303_v27 = vrot.slane %v21_v8, 1 }
   0x7   :  { %v102_v17 = vsel %vm1193_vm2, 0.0, %v101_v11  ;;  %v46_v28 = vand.u32 15, %v32_v23  ;;  %v34_v29 = vadd.s32 24, %v1177_v4  ;;  %vm306_vm4 = vcmp.lt.s32.totalorder %v1177_v4, 7 }
   0x8   :  { %1058 = vmatprep.mubr.msk.f32.mxu0 %vm107_vm1, %v102_v17  ;;  %vm1210_vm3 = vcmp.lt.s32.totalorder %v53_v19, 1  ;;  %v309_v31 = vsel %vm306_vm4, %v302_v25, %v303_v27  ;;  %v308_v33 = vsel %vm306_vm4, %v303_v27, %v304_v26  ;;  %v307_v36 = vsel %vm306_vm4, %v304_v26, %v305_v30 }
   0x9   :  { %1059 = vmatmul.mubr.msk.f32.vlgmr.msra.gmra.mrb[0].mxu0 %vm107_vm1, %v100_v14  ;;  %v104_v24 = vsel %vm1210_vm3, 0.0, %v99_v20  ;;  %vm1228_vm5 = vcmp.ge.s32.totalorder %v46_v28, 15  ;;  %v60_v34 = vand.u32 15, %v34_v29  ;;  %v310_v38 = vsel %vm306_vm4, %v305_v30, %v302_v25  ;;  %v25_v20 = vld [vmem:[%s1352_s4 + $0x1] sm:$0x1] }
   0xa   :  { %1065 = vmatpush3.msra.mxu0 %v989_v7  ;;  %1066 = vmatprep.mubr.msk.f32.mxu0 %vm107_vm1, %v20_v2  ;;  %v312_v35 = vsel %vm1228_vm5, 0.0, %v308_v33  ;;  %v1273_v17 = vsub.s32 0, %v1177_v4 }
   0xb   :  { %1072 = vmatprep.subr.mxu0 %v998_v18  ;;  %1061 = vmatprep.mubr.msk.f32.mxu1 %vm107_vm1, %v104_v24  ;;  %vm1241_vm6 = vcmp.ge.s32.totalorder %v60_v34, 15 }
   0xc   :  { %1062 = vmatmul.mubr.msk.f32.vlgmr.msra.gmra.mrb[0].mxu1 %vm107_vm1, %v98_v22  ;;  %v314_v39 = vsel %vm1241_vm6, 0.0, %v310_v38 }
   0xd   :  { %1081 = vmatpush3.msra.mxu1 %v483_v41 }
   0xe   :  { %1088 = vmatprep.subr.mxu1 %v1266_v42 }
  0x11   :  { %1067 = vmatmul.mubr.msk.f32.vlgmr.msra.gmra.mrb[0].mxu0 %vm107_vm1, %v21_v8 }
  0x12   :  { %1073 = vmatpush3.msra.mxu0 %v998_v18  ;;  %1069 = vmatprep.mubr.msk.f32.mxu0 %vm107_vm1, %v22_v12 }
  0x13   :  { %1104 = vmatprep.subr.mxu0 %v840_v40 }
  0x15   :  { %1070 = vmatmul.mubr.msk.f32.gmra.mrb[2].mxu0 %vm107_vm1, %v1175_v3 }
  0x16   :  { %1074 = vmatprep.mubr.msk.f32.mxu0 %vm107_vm1, %v309_v31 }
  0x19   :  { %1075 = vmatmul.mubr.msk.f32.vlgmr.msra.gmra.mrb[0].mxu0 %vm107_vm1, %v312_v35 }
  0x1a   :  { %1077 = vmatprep.mubr.msk.f32.mxu0 %vm107_vm1, %v307_v36  ;;  %1105 = vmatpush3.msra.mxu0 %v840_v40 }
  0x1d   :  { %1078 = vmatmul.mubr.msk.f32.gmra.mrb[2].mxu0 %vm107_vm1, %v314_v39 }
  0x1e   :  { %1106 = vmatprep.mubr.msk.f32.mxu0 %vm107_vm1, %v20_v2 }
  0x21   :  { %1107 = vmatmul.mubr.msk.f32.vlgmr.msra.gmra.mrb[4].mxu0 %vm107_vm1, %v21_v8 }
  0x22   :  { %1109 = vmatprep.mubr.msk.f32.mxu0 %vm107_vm1, %v22_v12 }
  0x25   :  { %1110 = vmatmul.mubr.msk.f32.gmra.mrb[6].mxu0 %vm107_vm1, %v1175_v3 }
  0xdf   :  { %v1063_v43 = vpop.f32.mrb[0].mxu1 }
  0xe0   :  { %v196_v44 = vpop.f32.mrb[1].mxu1 }
  0xec   :  { %v1076_v45 = vpop.f32.mrb[0].mxu0 }
  0xed   :  { %v428_v46 = vmul.f32 %v1076_v45, %v1076_v45  ;;  %v395_v47 = vpop.f32.mrb[1].mxu0 }
  0xee   :  { %v418_v48 = vadd.f32 %v1076_v45, %v395_v47  ;;  %v427_v49 = vmul.f32 %v395_v47, %v395_v47 }
  0xf0   :  { %v431_v50 = vadd.f32 %v428_v46, %v427_v49  ;;  %v1079_v51 = vpop.f32.mrb[2].mxu0 }
  0xf1   :  { %v1114_v52 = vadd.f32 %v1079_v51, %v1063_v43  ;;  %v405_v53 = vpop.f32.mrb[3].mxu0 }
  0xf2   :  { %v1115_v54 = vadd.f32 %v405_v53, %v196_v44 }
  0xf3   :  { %v430_v57 = vmul.f32 %v1114_v52, %v1114_v52 }
  0xf4   :  { %v419_v55 = vadd.f32 %v1115_v54, %v418_v48  ;;  %v429_v56 = vmul.f32 %v1115_v54, %v1115_v54 }
  0xf6   :  { %v420_v58 = vadd.f32 %v1114_v52, %v419_v55  ;;  %v432_v59 = vadd.f32 %v431_v50, %v429_v56  ;;  %v1012_v55 = vld [vmem:[%s1351_s2 + $0x10] sm:$0xff] }
  0xf8   :  { %v421_v60 = vrot.slane %v420_v58, 4  ;;  %v433_v61 = vadd.f32 %v432_v59, %v430_v57 }
  0xfa   :  { %v422_v62 = vadd.f32 %v421_v60, %v420_v58  ;;  %v434_v63 = vrot.slane %v433_v61, 4 }
  0xfc   :  { %v423_v0 = vrot.slane %v422_v62, 2  ;;  %v435_v1 = vadd.f32 %v434_v63, %v433_v61 }
  0xfe   :  { %v424_v2 = vadd.f32 %v423_v0, %v422_v62  ;;  %v436_v3 = vrot.slane %v435_v1, 2 }
 0x100   :  { %v425_v5 = vrot.slane %v424_v2, 1  ;;  %v437_v6 = vadd.f32 %v436_v3, %v435_v1 }
 0x102   :  { %v426_v7 = vadd.f32 %v425_v5, %v424_v2  ;;  %v438_v8 = vrot.slane %v437_v6, 1 }
 0x104   :  { %v439_v9 = vadd.f32 %v438_v8, %v437_v6  ;;  %v440_v10 = vmul.f32 0.03125, %v426_v7 }
 0x106   :  { %v441_v11 = vmul.f32 0.03125, %v439_v9  ;;  %v442_v12 = vmul.f32 %v440_v10, %v440_v10 }
 0x108   :  { %v443_v14 = vsub.f32 %v441_v11, %v442_v12 }
 0x10a   :  { %v444_v15 = vadd.f32 1e-05, %v443_v14 }
 0x10c   :  { %1130 = vrsqrt.f32 %v444_v15 }
 0x116   :  { %v1131_v18 = vpop.eup %1130 }
 0x117   :  { %v446_v19 = vmul.f32 %v1131_v18, %v24_v16 }
 0x119   :  { %v447_v22 = vmul.f32 %v446_v19, %v440_v10  ;;  %v452_v23 = vrot.slane %v446_v19, %v1273_v17 }
 0x11b   :  { %v448_v24 = vsub.f32 %v25_v20, %v447_v22  ;;  %v455_v25 = vmul.f32 %v1115_v54, %v452_v23  ;;  %v453_v26 = vmul.f32 %v452_v23, %v395_v47  ;;  %v456_v27 = vmul.f32 %v1114_v52, %v452_v23 }
 0x11c   :  { %v454_v28 = vmul.f32 %v1076_v45, %v452_v23 }
 0x11d   :  { %v460_v29 = vrot.slane %v448_v24, %v1273_v17 }
 0x11f   :  { %v463_v30 = vadd.f32 %v460_v29, %v455_v25  ;;  %v461_v31 = vadd.f32 %v460_v29, %v453_v26  ;;  %v464_v33 = vadd.f32 %v460_v29, %v456_v27  ;;  %v462_v34 = vadd.f32 %v460_v29, %v454_v28  ;;  %v28_v27 = vld [vmem:[%s1352_s4 + $0x4] sm:$0x1] }
 0x121   :  { %v467_v35 = vmax.f32 %v463_v30, 0.0  ;;  %v465_v36 = vmax.f32 %v461_v31, 0.0  ;;  %v468_v38 = vmax.f32 %v464_v33, 0.0  ;;  %v466_v39 = vmax.f32 %v462_v34, 0.0  ;;  %v29_v30 = vld [vmem:[%s1352_s4 + $0x5] sm:$0x1] }
 0x123   :  { %v680_v40 = vrot.slane %v467_v35, 1  ;;  %v471_v41 = vrot.slane %v465_v36, 7  ;;  %v474_v43 = vrot.slane %v468_v38, 7  ;;  %v472_v44 = vrot.slane %v466_v39, 7 }
 0x124   :  { %v473_v46 = vrot.slane %v467_v35, 7  ;;  %v678_v48 = vrot.slane %v465_v36, 1  ;;  %v679_v49 = vrot.slane %v466_v39, 1  ;;  %v681_v47 = vrot.slane %v468_v38, 1 }
 0x125   :  { %v478_v45 = vsel %vm97_vm0, %v474_v43, %v471_v41  ;;  %v477_v50 = vsel %vm97_vm0, %v471_v41, %v472_v44 }
 0x126   :  { %v479_v51 = vsel %vm1193_vm2, 0.0, %v478_v45  ;;  %v476_v52 = vsel %vm97_vm0, %v472_v44, %v473_v46  ;;  %v475_v53 = vsel %vm97_vm0, %v473_v46, %v474_v43  ;;  %v684_v54 = vsel %vm306_vm4, %v678_v48, %v679_v49 }
 0x127   :  { %1082 = vmatprep.mubr.msk.f32.mxu1 %vm107_vm1, %v479_v51  ;;  %v683_v56 = vsel %vm306_vm4, %v679_v49, %v680_v40  ;;  %v682_v13 = vsel %vm306_vm4, %v680_v40, %v681_v47  ;;  %v685_v57 = vsel %vm306_vm4, %v681_v47, %v678_v48  ;;  %v481_v58 = vsel %vm1210_vm3, 0.0, %v476_v52 }
 0x128   :  { %1083 = vmatmul.mubr.msk.f32.vlgmr.msra.gmra.mrb[2].mxu1 %vm107_vm1, %v477_v50  ;;  %v687_v4 = vsel %vm1228_vm5, 0.0, %v683_v56  ;;  %v689_v21 = vsel %vm1241_vm6, 0.0, %v685_v57 }
 0x129   :  { %1089 = vmatpush3.msra.mxu1 %v1266_v42  ;;  %1085 = vmatprep.mubr.msk.f32.mxu1 %vm107_vm1, %v481_v58  ;;  %v1108_v42 = vpop.f32.mrb[4].mxu0 }
 0x12a   :  { %1096 = vmatprep.subr.mxu1 %v1012_v55  ;;  %v936_v59 = vmul.f32 %v1108_v42, %v1108_v42  ;;  %v907_v60 = vpop.f32.mrb[5].mxu0 }
 0x12b   :  { %v926_v61 = vadd.f32 %v1108_v42, %v907_v60  ;;  %v935_v62 = vmul.f32 %v907_v60, %v907_v60  ;;  %v1111_v0 = vpop.f32.mrb[6].mxu0 }
 0x12c   :  { %1086 = vmatmul.mubr.msk.f32.gmra.mrb[4].mxu1 %vm107_vm1, %v475_v53  ;;  %v917_v1 = vpop.f32.mrb[7].mxu0  ;;  %v938_v2 = vmul.f32 %v1111_v0, %v1111_v0 }
 0x12d   :  { %1090 = vmatprep.mubr.msk.f32.mxu1 %vm107_vm1, %v465_v36  ;;  %v939_v63 = vadd.f32 %v936_v59, %v935_v62  ;;  %v927_v32 = vadd.f32 %v926_v61, %v917_v1  ;;  %v937_v3 = vmul.f32 %v917_v1, %v917_v1 }
 0x12f   :  { %v928_v5 = vadd.f32 %v1111_v0, %v927_v32  ;;  %v940_v6 = vadd.f32 %v939_v63, %v937_v3 }
 0x130   :  { %1091 = vmatmul.mubr.msk.f32.vlgmr.msra.gmra.mrb[2].mxu1 %vm107_vm1, %v466_v39 }
 0x131   :  { %1097 = vmatpush3.msra.mxu1 %v1012_v55  ;;  %1093 = vmatprep.mubr.msk.f32.mxu1 %vm107_vm1, %v467_v35  ;;  %v929_v7 = vrot.slane %v928_v5, 4  ;;  %v941_v8 = vadd.f32 %v940_v6, %v938_v2 }
 0x133   :  { %v930_v9 = vadd.f32 %v929_v7, %v928_v5  ;;  %v942_v37 = vrot.slane %v941_v8, 4 }
 0x134   :  { %1094 = vmatmul.mubr.msk.f32.gmra.mrb[4].mxu1 %vm107_vm1, %v468_v38 }
 0x135   :  { %1098 = vmatprep.mubr.msk.f32.mxu1 %vm107_vm1, %v684_v54  ;;  %v931_v10 = vrot.slane %v930_v9, 2  ;;  %v943_v11 = vadd.f32 %v942_v37, %v941_v8 }
 0x137   :  { %v932_v12 = vadd.f32 %v931_v10, %v930_v9  ;;  %v944_v14 = vrot.slane %v943_v11, 2  ;;  %v26_v9 = vld [vmem:[%s1352_s4 + $0x2] sm:$0x1] }
 0x138   :  { %1099 = vmatmul.mubr.msk.f32.vlgmr.msra.gmra.mrb[2].mxu1 %vm107_vm1, %v687_v4 }
 0x139   :  { %1101 = vmatprep.mubr.msk.f32.mxu1 %vm107_vm1, %v682_v13  ;;  %v933_v15 = vrot.slane %v932_v12, 1  ;;  %v945_v16 = vadd.f32 %v944_v14, %v943_v11  ;;  %v27_v11 = vld [vmem:[%s1352_s4 + $0x3] sm:$0x1] }
 0x13b   :  { %v934_v18 = vadd.f32 %v933_v15, %v932_v12  ;;  %v946_v19 = vrot.slane %v945_v16, 1 }
 0x13c   :  { %1102 = vmatmul.mubr.msk.f32.gmra.mrb[4].mxu1 %vm107_vm1, %v689_v21 }
 0x13d   :  { %v947_v20 = vadd.f32 %v946_v19, %v945_v16  ;;  %v948_v22 = vmul.f32 0.03125, %v934_v18 }
 0x13f   :  { %v949_v23 = vmul.f32 0.03125, %v947_v20  ;;  %v950_v24 = vmul.f32 %v948_v22, %v948_v22 }
 0x141   :  { %v951_v25 = vsub.f32 %v949_v23, %v950_v24 }
 0x143   :  { %v952_v26 = vadd.f32 1e-05, %v951_v25 }
 0x145   :  { %1132 = vrsqrt.f32 %v952_v26 }
 0x14f   :  { %v1133_v28 = vpop.eup %1132 }
 0x150   :  { %v954_v29 = vmul.f32 %v1133_v28, %v28_v27 }
 0x152   :  { %v955_v31 = vmul.f32 %v954_v29, %v948_v22  ;;  %v960_v33 = vrot.slane %v954_v29, %v1273_v17 }
 0x154   :  { %v956_v34 = vsub.f32 %v29_v30, %v955_v31  ;;  %v961_v35 = vmul.f32 %v960_v33, %v907_v60  ;;  %v962_v36 = vmul.f32 %v1108_v42, %v960_v33  ;;  %v963_v38 = vmul.f32 %v960_v33, %v917_v1 }
 0x155   :  { %v964_v39 = vmul.f32 %v1111_v0, %v960_v33 }
 0x156   :  { %v968_v40 = vrot.slane %v956_v34, %v1273_v17 }
 0x158   :  { %v969_v41 = vadd.f32 %v968_v40, %v961_v35  ;;  %v970_v43 = vadd.f32 %v968_v40, %v962_v36  ;;  %v971_v44 = vadd.f32 %v968_v40, %v963_v38  ;;  %v972_v46 = vadd.f32 %v968_v40, %v964_v39 }
 0x20b   :  { %v1100_v48 = vpop.f32.mrb[2].mxu1 }
 0x20c   :  { %v803_v49 = vmul.f32 %v1100_v48, %v1100_v48  ;;  %v770_v47 = vpop.f32.mrb[3].mxu1 }
 0x20d   :  { %v793_v45 = vadd.f32 %v1100_v48, %v770_v47  ;;  %v802_v50 = vmul.f32 %v770_v47, %v770_v47 }
 0x20f   :  { %v806_v51 = vadd.f32 %v803_v49, %v802_v50  ;;  %v1103_v52 = vpop.f32.mrb[4].mxu1 }
 0x210   :  { %v780_v53 = vpop.f32.mrb[5].mxu1  ;;  %v805_v56 = vmul.f32 %v1103_v52, %v1103_v52 }
 0x211   :  { %v794_v54 = vadd.f32 %v793_v45, %v780_v53  ;;  %v804_v55 = vmul.f32 %v780_v53, %v780_v53 }
 0x213   :  { %v795_v13 = vadd.f32 %v1103_v52, %v794_v54  ;;  %v807_v57 = vadd.f32 %v806_v51, %v804_v55 }
 0x215   :  { %v796_v58 = vrot.slane %v795_v13, 4  ;;  %v808_v4 = vadd.f32 %v807_v57, %v805_v56 }
 0x217   :  { %v797_v21 = vadd.f32 %v796_v58, %v795_v13  ;;  %v809_v42 = vrot.slane %v808_v4, 4 }
 0x219   :  { %v798_v59 = vrot.slane %v797_v21, 2  ;;  %v810_v60 = vadd.f32 %v809_v42, %v808_v4 }
 0x21b   :  { %v799_v61 = vadd.f32 %v798_v59, %v797_v21  ;;  %v811_v62 = vrot.slane %v810_v60, 2 }
 0x21d   :  { %v800_v63 = vrot.slane %v799_v61, 1  ;;  %v812_v0 = vadd.f32 %v811_v62, %v810_v60 }
 0x21f   :  { %v801_v1 = vadd.f32 %v800_v63, %v799_v61  ;;  %v813_v2 = vrot.slane %v812_v0, 1 }
 0x221   :  { %v814_v32 = vadd.f32 %v813_v2, %v812_v0  ;;  %v815_v3 = vmul.f32 0.03125, %v801_v1 }
 0x223   :  { %v816_v5 = vmul.f32 0.03125, %v814_v32  ;;  %v817_v6 = vmul.f32 %v815_v3, %v815_v3 }
 0x225   :  { %v818_v7 = vsub.f32 %v816_v5, %v817_v6 }
 0x227   :  { %v819_v8 = vadd.f32 1e-05, %v818_v7 }
 0x229   :  { %1134 = vrsqrt.f32 %v819_v8 }
 0x233   :  { %v1135_v37 = vpop.eup %1134 }
 0x234   :  { %v821_v10 = vmul.f32 %v1135_v37, %v26_v9 }
 0x236   :  { %v822_v12 = vmul.f32 %v821_v10, %v815_v3  ;;  %v827_v14 = vrot.slane %v821_v10, %v1273_v17 }
 0x238   :  { %v823_v15 = vsub.f32 %v27_v11, %v822_v12  ;;  %v828_v16 = vmul.f32 %v827_v14, %v770_v47  ;;  %v829_v18 = vmul.f32 %v1100_v48, %v827_v14  ;;  %v830_v19 = vmul.f32 %v827_v14, %v780_v53 }
 0x239   :  { %v831_v20 = vmul.f32 %v1103_v52, %v827_v14 }
 0x23a   :  { %v835_v22 = vrot.slane %v823_v15, %v1273_v17 }
 0x23c   :  { %v836_v23 = vadd.f32 %v835_v22, %v828_v16  ;;  %v837_v24 = vadd.f32 %v835_v22, %v829_v18  ;;  %v838_v25 = vadd.f32 %v835_v22, %v830_v19  ;;  %v839_v26 = vadd.f32 %v835_v22, %v831_v20 }
 0x23e   :  { %v973_v27 = vadd.f32 %v969_v41, %v836_v23  ;;  %v974_v28 = vadd.f32 %v970_v43, %v837_v24  ;;  %v975_v29 = vadd.f32 %v971_v44, %v838_v25  ;;  %v976_v30 = vadd.f32 %v972_v46, %v839_v26 }
 0x240   :  { %v977_v31 = vmax.f32 %v973_v27, 0.0  ;;  %v978_v33 = vmax.f32 %v974_v28, 0.0  ;;  %v979_v34 = vmax.f32 %v975_v29, 0.0  ;;  %v980_v35 = vmax.f32 %v976_v30, 0.0 }
 0x242   :  { %981 = vst [vmem:[%s1353_s5] sm:$0xff] %v977_v31  ;;  %982 = vst [vmem:[%s1353_s5 + $0x8] sm:$0xff] %v978_v33 }
 0x243   :  { %983 = vst [vmem:[%s1353_s5 + $0x10] sm:$0xff] %v979_v34  ;;  %984 = vst [vmem:[%s1353_s5 + $0x18] sm:$0xff] %v980_v35 }

</bundles_post_ra>
